<compile_context>
chip_gen: v7x
topology: tpu7x:2x2x1
jax: 0.10.0
libtpu: 0.0.40
codegen_flags: <defaults>
</compile_context>

<pallas_src>
import jax
import jax.numpy as jnp
from jax.experimental import pallas as pl
from jax.experimental.pallas import tpu as pltpu

_MAX_GROUPS = 64  # max unrolled 128-lane groups per spatial tile (<= 8192 lanes)


def _cdiv(a, b):
    return (a + b - 1) // b


def _round_up(v, m):
    return ((v + m - 1) // m) * m


def _tpu_budgets():
    """(x-block target bytes, scoped-VMEM ceiling) per TPU generation."""
    vmem_cap = None
    try:
        vmem_cap = getattr(pltpu.get_tpu_info(), "vmem_capacity_bytes", None)
    except Exception:
        vmem_cap = None
    if vmem_cap is None:
        vmem_cap = 64 * 1024 * 1024                    # conservative (v7x-sized)
    if vmem_cap >= 100 * 1024 * 1024:                  # v5e / v6e: 128 MiB VMEM
        return 16 * 1024 * 1024, 96 * 1024 * 1024
    return 12 * 1024 * 1024, 48 * 1024 * 1024          # v7x: 64 MiB per TC


def _is_dual_tensorcore():
    """True on parts with 2 TensorCores behind one device (v7x, v4/v5p)."""
    try:
        kind = jax.devices()[0].device_kind.lower()
    except Exception:
        return False
    return any(tag in kind for tag in ("7", "v4", "v5p"))


def _make_kernel(*, hw, hw_tile, num_k, tb, lane):
    """Builds the kernel for fixed static tiling parameters."""
    n_groups = hw_tile // lane                      # lane-groups per full tile
    rem = hw - (num_k - 1) * hw_tile                # valid lanes in last tile (>=1)
    full_last = rem // lane                         # fully-valid groups, last tile
    tail = rem - full_last * lane                   # valid lanes in partial group

    def _accumulate(x_ref, sum_acc, max_acc, count):
        # Pure-VPU element-wise accumulation of `count` lane-groups; no
        # cross-lane (XLU) work and no relayout in the hot loop.
        for g in range(count):
            chunk = x_ref[:, :, pl.ds(g * lane, lane)].astype(jnp.float32)
            sum_acc[...] += chunk
            max_acc[...] = jnp.maximum(max_acc[...], chunk)

    def _last_tile(x_ref, sum_acc, max_acc):
        # Only the final spatial tile can be ragged: mask just its partial
        # 128-lane group; wholly-invalid groups are never read.
        _accumulate(x_ref, sum_acc, max_acc, full_last)
        if tail > 0:
            off = full_last * lane
            chunk = x_ref[:, :, pl.ds(off, lane)].astype(jnp.float32)
            idx = jax.lax.broadcasted_iota(jnp.int32, chunk.shape, 2)
            valid = idx < tail
            sum_acc[...] += jnp.where(valid, chunk, 0.0)
            max_acc[...] = jnp.maximum(
                max_acc[...], jnp.where(valid, chunk, -jnp.inf))

    def kernel(x_ref, w1t_ref, w2t_ref, out_ref, sum_acc, max_acc):
        # x_ref:   (TB, C, HW_TILE)  current batch-tile / spatial-tile
        # w1t_ref: (C, Cr) = W1.T ;  w2t_ref: (Cr, C) = W2.T
        # out_ref: (TB, 1, C)        sigmoid attention weights
        # sum_acc / max_acc: (TB, C, LANE) f32 lane-partial accumulators
        k = pl.program_id(1)

        @pl.when(k == 0)
        def _init():
            sum_acc[...] = jnp.zeros_like(sum_acc)
            max_acc[...] = jnp.full_like(max_acc, -jnp.inf)

        if num_k > 1:
            @pl.when(k < num_k - 1)
            def _interior():
                _accumulate(x_ref, sum_acc, max_acc, n_groups)

        @pl.when(k == num_k - 1)
        def _finalize():
            _last_tile(x_ref, sum_acc, max_acc)
            # One cross-lane fold + relayout + tiny shared MLP per batch tile.
            avg = jnp.sum(sum_acc[...], axis=2) * (1.0 / hw)       # (TB, C)
            mx = jnp.max(max_acc[...], axis=2)                     # (TB, C)
            pooled = jnp.concatenate([avg, mx], axis=0)            # (2*TB, C)
            h = jnp.dot(pooled, w1t_ref[...],
                        preferred_element_type=jnp.float32)        # (2*TB, Cr)
            h = jnp.maximum(h, 0.0)                                # ReLU
            o = jnp.dot(h, w2t_ref[...],
                        preferred_element_type=jnp.float32)        # (2*TB, C)
            att = jax.nn.sigmoid(o[:tb, :] + o[tb:, :])            # (TB, C)
            out_ref[...] = att[:, None, :].astype(out_ref.dtype)

    return kernel


def channel_attention(x, w1, w2, *, max_hw_tile=None):
    """ChannelAttentionModule forward.

    x:  (B, C, H, W)
    w1: (Cr, C)   -- first 1x1 conv weight (no bias)
    w2: (C, Cr)   -- second 1x1 conv weight (no bias)
    Returns (B, C, 1, 1) sigmoid attention weights.
    """
    B, C, H, W = x.shape
    Cr = w1.shape[0]
    HW = H * W
    elem = jnp.dtype(x.dtype).itemsize

    block_target, vmem_ceiling = _tpu_budgets()
    dual = _is_dual_tensorcore()

    # lane width of the accumulators / chunks (full HW when HW < 128)
    lane = HW if HW < 128 else 128

    # --- batch tile: keep the parallel grid axis >= 2 on dual-TC parts ---
    tb = B
    if dual and B >= 2:
        tb = _cdiv(B, 2)
    tb = max(1, min(tb, block_target // max(1, C * lane * elem)))
    tb = min(tb, B)

    # --- spatial tile: multiple of 128 lanes, never larger than the array ---
    if HW < 128:
        hw_tile = HW
    else:
        budget_lanes = (block_target // (tb * C * elem)) // 128 * 128
        hw_tile = max(128, min((HW // 128) * 128, budget_lanes,
                               _MAX_GROUPS * 128))
        if max_hw_tile is not None:
            hw_tile = max(128, min(hw_tile, (max_hw_tile // 128) * 128))
    num_k = _cdiv(HW, hw_tile)
    grid = (_cdiv(B, tb), num_k)

    x_flat = x.reshape(B, C, HW)            # free reshape, no HBM copy / pad
    w1t = w1.T.astype(jnp.float32)          # (C, Cr)
    w2t = w2.T.astype(jnp.float32)          # (Cr, C)

    # --- explicit scoped-VMEM budget ---
    c_pad = _round_up(C, 8)
    x_block = tb * c_pad * _round_up(hw_tile, 128) * elem
    acc_bytes = tb * c_pad * 128 * 4
    needed = (2 * x_block                          # double-buffered x block
              + 2 * (c_pad * _round_up(Cr, 128) + _round_up(Cr, 8) * _round_up(C, 128)) * 4
              + 2 * tb * 8 * _round_up(C, 128) * 4  # output block
              + 2 * acc_bytes                      # sum / max accumulators
              + 4 * acc_bytes                      # chunk-sized temporaries
              + (1 << 20))                         # headroom
    vmem_limit = int(min(vmem_ceiling, max(needed, 16 * 1024 * 1024)))

    kernel = _make_kernel(hw=HW, hw_tile=hw_tile, num_k=num_k, tb=tb, lane=lane)

    out = pl.pallas_call(
        kernel,
        out_shape=jax.ShapeDtypeStruct((B, 1, C), jnp.float32),
        grid_spec=pltpu.PrefetchScalarGridSpec(
            num_scalar_prefetch=0,
            grid=grid,
            in_specs=[
                pl.BlockSpec((tb, C, hw_tile), lambda b, k: (b, 0, k)),
                pl.BlockSpec((C, Cr), lambda b, k: (0, 0)),
                pl.BlockSpec((Cr, C), lambda b, k: (0, 0)),
            ],
            out_specs=pl.BlockSpec((tb, 1, C), lambda b, k: (b, 0, 0)),
            scratch_shapes=[
                pltpu.VMEM((tb, C, lane), jnp.float32),   # lane-partial running sum
                pltpu.VMEM((tb, C, lane), jnp.float32),   # lane-partial running max
            ],
        ),
        compiler_params=pltpu.CompilerParams(
            dimension_semantics=("parallel", "arbitrary"),
            vmem_limit_bytes=vmem_limit,
        ),
    )(x_flat, w1t, w2t)

    return out.reshape(B, C)[:, :, None, None]


def _reference(x, w1, w2):
    # pure-JAX reference of the PyTorch forward
    avg = jnp.mean(x, axis=(2, 3))                        # (B, C)
    mx = jnp.max(x, axis=(2, 3))                          # (B, C)

    def mlp(v):
        h = jnp.maximum(v @ w1.T, 0.0)                    # (B, Cr)
        return h @ w2.T                                   # (B, C)

    out = jax.nn.sigmoid(mlp(avg) + mlp(mx))              # (B, C)
    return out[:, :, None, None]


if __name__ == "__main__":
    ratio = 4

    # Case 1: clean shapes, single-step reduction, no masking.
    B, C, H, W = 2, 8, 16, 16
    Cr = C // ratio
    key = jax.random.PRNGKey(0)
    kx, k1, k2 = jax.random.split(key, 3)
    x = jax.random.normal(kx, (B, C, H, W), dtype=jnp.float32)
    w1 = jax.random.normal(k1, (Cr, C), dtype=jnp.float32) * 0.1
    w2 = jax.random.normal(k2, (C, Cr), dtype=jnp.float32) * 0.1

    out = jax.block_until_ready(channel_attention(x, w1, w2))
    ref = _reference(x, w1, w2)
    assert out.shape == (B, C, 1, 1)
    assert jnp.allclose(out, ref, atol=1e-5, rtol=1e-5), "mismatch (case 1)"

    # Case 2: odd spatial size + forced small spatial tile -> multi-step
    # reduction, -inf max init, and the masked partial-group path on the last
    # tile (no host-side padding anywhere).
    B2, C2, H2, W2 = 3, 16, 13, 13
    Cr2 = C2 // ratio
    kx2, k3, k4 = jax.random.split(jax.random.PRNGKey(0), 3)
    x2 = jax.random.normal(kx2, (B2, C2, H2, W2), dtype=jnp.float32)
    w1b = jax.random.normal(k3, (Cr2, C2), dtype=jnp.float32) * 0.1
    w2b = jax.random.normal(k4, (C2, Cr2), dtype=jnp.float32) * 0.1

    out2 = jax.block_until_ready(channel_attention(x2, w1b, w2b, max_hw_tile=128))
    ref2 = _reference(x2, w1b, w2b)
    assert out2.shape == (B2, C2, 1, 1)
    assert jnp.allclose(out2, ref2, atol=1e-5, rtol=1e-5), "mismatch (case 2)"

    # Case 3: larger spatial extent -> multiple unrolled 128-lane groups per
    # tile (unmasked multi-group accumulation path).
    B3, C3, H3, W3 = 2, 8, 48, 48
    Cr3 = C3 // ratio
    kx3, k5, k6 = jax.random.split(jax.random.PRNGKey(0), 3)
    x3 = jax.random.normal(kx3, (B3, C3, H3, W3), dtype=jnp.float32)
    w1c = jax.random.normal(k5, (Cr3, C3), dtype=jnp.float32) * 0.1
    w2c = jax.random.normal(k6, (C3, Cr3), dtype=jnp.float32) * 0.1

    out3 = jax.block_until_ready(channel_attention(x3, w1c, w2c))
    ref3 = _reference(x3, w1c, w2c)
    assert out3.shape == (B3, C3, 1, 1)
    assert jnp.allclose(out3, ref3, atol=1e-5, rtol=1e-5), "mismatch (case 3)"

    print("KERNEL_OK")
</pallas_src>

<mosaic_0001>
module attributes {stable_mosaic.version = 11 : i64} {
  func.func @kernel(%arg0: i32, %arg1: i32, %arg2: memref<2x8x256xf32, #tpu.memory_space<vmem>>, %arg3: memref<8x2xf32, #tpu.memory_space<vmem>>, %arg4: memref<2x8xf32, #tpu.memory_space<vmem>>, %arg5: memref<2x1x8xf32, #tpu.memory_space<vmem>>, %arg6: memref<2x8x128xf32, #tpu.memory_space<vmem>>, %arg7: memref<2x8x128xf32, #tpu.memory_space<vmem>>) attributes {dimension_semantics = [#tpu.dimension_semantics<parallel>, #tpu.dimension_semantics<arbitrary>], iteration_bounds = array<i64: 1, 1>, scalar_prefetch = 0 : i64, scratch_operands = 2 : i64, tpu.core_type = #tpu.core_type<tc>, window_params = [{transform_indices = @transform_0, window_bounds = array<i64: 2, 8, 256>}, {pipeline_mode = #tpu.pipeline_mode<synchronous>, transform_indices = @transform_1, window_bounds = array<i64: 8, 2>}, {pipeline_mode = #tpu.pipeline_mode<synchronous>, transform_indices = @transform_2, window_bounds = array<i64: 2, 8>}, {transform_indices = @transform_3, window_bounds = array<i64: 2, 1, 8>}]} {
    %c0_i32 = arith.constant 0 : i32
    %0 = arith.cmpi eq, %arg1, %c0_i32 : i32
    %1 = arith.extui %0 : i1 to i32
    %c0_i32_0 = arith.constant 0 : i32
    %2 = arith.cmpi ne, %1, %c0_i32_0 : i32
    scf.if %2 {
      %cst = arith.constant 0.000000e+00 : f32
      %6 = vector.broadcast %cst : f32 to vector<2x8x128xf32>
      %c0 = arith.constant 0 : index
      %c0_3 = arith.constant 0 : index
      %c0_4 = arith.constant 0 : index
      %7 = vector.load %arg6[%c0, %c0_3, %c0_4] : memref<2x8x128xf32, #tpu.memory_space<vmem>>, vector<2x8x128xf32>
      tpu.vector_store %arg6[%c0, %c0_3, %c0_4], %6 {strides = array<i32>} : memref<2x8x128xf32, #tpu.memory_space<vmem>>, vector<2x8x128xf32>,
      %cst_5 = arith.constant 0xFF800000 : f32
      %8 = vector.broadcast %cst_5 : f32 to vector<2x8x128xf32>
      %c0_6 = arith.constant 0 : index
      %c0_7 = arith.constant 0 : index
      %c0_8 = arith.constant 0 : index
      %9 = vector.load %arg7[%c0_6, %c0_7, %c0_8] : memref<2x8x128xf32, #tpu.memory_space<vmem>>, vector<2x8x128xf32>
      tpu.vector_store %arg7[%c0_6, %c0_7, %c0_8], %8 {strides = array<i32>} : memref<2x8x128xf32, #tpu.memory_space<vmem>>, vector<2x8x128xf32>,
    } else {
    }
    %c0_i32_1 = arith.constant 0 : i32
    %3 = arith.cmpi eq, %arg1, %c0_i32_1 : i32
    %4 = arith.extui %3 : i1 to i32
    %c0_i32_2 = arith.constant 0 : i32
    %5 = arith.cmpi ne, %4, %c0_i32_2 : i32
    scf.if %5 {
      %c0 = arith.constant 0 : index
      %c0_3 = arith.constant 0 : index
      %c0_4 = arith.constant 0 : index
      %6 = vector.load %arg2[%c0, %c0_3, %c0_4] : memref<2x8x256xf32, #tpu.memory_space<vmem>>, vector<2x8x128xf32>
      %c0_5 = arith.constant 0 : index
      %c0_6 = arith.constant 0 : index
      %c0_7 = arith.constant 0 : index
      %7 = vector.load %arg6[%c0_5, %c0_6, %c0_7] : memref<2x8x128xf32, #tpu.memory_space<vmem>>, vector<2x8x128xf32>
      %8 = arith.addf %7, %6 : vector<2x8x128xf32>
      %c0_8 = arith.constant 0 : index
      %c0_9 = arith.constant 0 : index
      %c0_10 = arith.constant 0 : index
      %9 = vector.load %arg6[%c0_8, %c0_9, %c0_10] : memref<2x8x128xf32, #tpu.memory_space<vmem>>, vector<2x8x128xf32>
      tpu.vector_store %arg6[%c0_8, %c0_9, %c0_10], %8 {strides = array<i32>} : memref<2x8x128xf32, #tpu.memory_space<vmem>>, vector<2x8x128xf32>,
      %c0_11 = arith.constant 0 : index
      %c0_12 = arith.constant 0 : index
      %c0_13 = arith.constant 0 : index
      %10 = vector.load %arg7[%c0_11, %c0_12, %c0_13] : memref<2x8x128xf32, #tpu.memory_space<vmem>>, vector<2x8x128xf32>
      %11 = arith.maximumf %10, %6 : vector<2x8x128xf32>
      %c0_14 = arith.constant 0 : index
      %c0_15 = arith.constant 0 : index
      %c0_16 = arith.constant 0 : index
      %12 = vector.load %arg7[%c0_14, %c0_15, %c0_16] : memref<2x8x128xf32, #tpu.memory_space<vmem>>, vector<2x8x128xf32>
      tpu.vector_store %arg7[%c0_14, %c0_15, %c0_16], %11 {strides = array<i32>} : memref<2x8x128xf32, #tpu.memory_space<vmem>>, vector<2x8x128xf32>,
      %c0_17 = arith.constant 0 : index
      %c0_18 = arith.constant 0 : index
      %c128 = arith.constant 128 : index
      %13 = vector.load %arg2[%c0_17, %c0_18, %c128] : memref<2x8x256xf32, #tpu.memory_space<vmem>>, vector<2x8x128xf32>
      %c0_19 = arith.constant 0 : index
      %c0_20 = arith.constant 0 : index
      %c0_21 = arith.constant 0 : index
      %14 = vector.load %arg6[%c0_19, %c0_20, %c0_21] : memref<2x8x128xf32, #tpu.memory_space<vmem>>, vector<2x8x128xf32>
      %15 = arith.addf %14, %13 : vector<2x8x128xf32>
      %c0_22 = arith.constant 0 : index
      %c0_23 = arith.constant 0 : index
      %c0_24 = arith.constant 0 : index
      %16 = vector.load %arg6[%c0_22, %c0_23, %c0_24] : memref<2x8x128xf32, #tpu.memory_space<vmem>>, vector<2x8x128xf32>
      tpu.vector_store %arg6[%c0_22, %c0_23, %c0_24], %15 {strides = array<i32>} : memref<2x8x128xf32, #tpu.memory_space<vmem>>, vector<2x8x128xf32>,
      %c0_25 = arith.constant 0 : index
      %c0_26 = arith.constant 0 : index
      %c0_27 = arith.constant 0 : index
      %17 = vector.load %arg7[%c0_25, %c0_26, %c0_27] : memref<2x8x128xf32, #tpu.memory_space<vmem>>, vector<2x8x128xf32>
      %18 = arith.maximumf %17, %13 : vector<2x8x128xf32>
      %c0_28 = arith.constant 0 : index
      %c0_29 = arith.constant 0 : index
      %c0_30 = arith.constant 0 : index
      %19 = vector.load %arg7[%c0_28, %c0_29, %c0_30] : memref<2x8x128xf32, #tpu.memory_space<vmem>>, vector<2x8x128xf32>
      tpu.vector_store %arg7[%c0_28, %c0_29, %c0_30], %18 {strides = array<i32>} : memref<2x8x128xf32, #tpu.memory_space<vmem>>, vector<2x8x128xf32>,
      %c0_31 = arith.constant 0 : index
      %c0_32 = arith.constant 0 : index
      %c0_33 = arith.constant 0 : index
      %20 = vector.load %arg6[%c0_31, %c0_32, %c0_33] : memref<2x8x128xf32, #tpu.memory_space<vmem>>, vector<2x8x128xf32>
      %cst = arith.constant dense<0.000000e+00> : vector<2x8xf32>
      %21 = vector.multi_reduction <add>, %20, %cst [2] : vector<2x8x128xf32> to vector<2x8xf32>
      %cst_34 = arith.constant 3.906250e-03 : f32
      %22 = vector.broadcast %cst_34 : f32 to vector<2x8xf32>
      %23 = arith.mulf %21, %22 : vector<2x8xf32>
      %c0_35 = arith.constant 0 : index
      %c0_36 = arith.constant 0 : index
      %c0_37 = arith.constant 0 : index
      %24 = vector.load %arg7[%c0_35, %c0_36, %c0_37] : memref<2x8x128xf32, #tpu.memory_space<vmem>>, vector<2x8x128xf32>
      %cst_38 = arith.constant dense<0xFF800000> : vector<2x8xf32>
      %25 = vector.multi_reduction <maximumf>, %24, %cst_38 [2] : vector<2x8x128xf32> to vector<2x8xf32>
      %26 = tpu.concatenate %23, %25 in 0 : vector<2x8xf32>, vector<2x8xf32> -> vector<4x8xf32>
      %c0_39 = arith.constant 0 : index
      %c0_40 = arith.constant 0 : index
      %27 = vector.load %arg3[%c0_39, %c0_40] : memref<8x2xf32, #tpu.memory_space<vmem>>, vector<8x2xf32>
      %cst_41 = arith.constant dense<0.000000e+00> : vector<4x2xf32>
      %28 = tpu.matmul %26, %27, %cst_41 {dimension_numbers = #tpu.dot_dimension_numbers<[1], [0], [0], [1], [0, 0, 1, 1], [], []>} : vector<4x8xf32>, vector<8x2xf32>, vector<4x2xf32> -> vector<4x2xf32>
      %cst_42 = arith.constant 0.000000e+00 : f32
      %29 = vector.broadcast %cst_42 : f32 to vector<4x2xf32>
      %30 = arith.maximumf %28, %29 : vector<4x2xf32>
      %c0_43 = arith.constant 0 : index
      %c0_44 = arith.constant 0 : index
      %31 = vector.load %arg4[%c0_43, %c0_44] : memref<2x8xf32, #tpu.memory_space<vmem>>, vector<2x8xf32>
      %cst_45 = arith.constant dense<0.000000e+00> : vector<4x8xf32>
      %32 = tpu.matmul %30, %31, %cst_45 {dimension_numbers = #tpu.dot_dimension_numbers<[1], [0], [0], [1], [0, 0, 1, 1], [], []>} : vector<4x2xf32>, vector<2x8xf32>, vector<4x8xf32> -> vector<4x8xf32>
      %33 = vector.extract_strided_slice %32 {offsets = [0, 0], sizes = [2, 8], strides = [1, 1]} : vector<4x8xf32> to vector<2x8xf32>
      %34 = vector.extract_strided_slice %32 {offsets = [2, 0], sizes = [2, 8], strides = [1, 1]} : vector<4x8xf32> to vector<2x8xf32>
      %35 = arith.addf %33, %34 : vector<2x8xf32>
      %36 = arith.negf %35 : vector<2x8xf32>
      %37 = math.exp %36 : vector<2x8xf32>
      %cst_46 = arith.constant 1.000000e+00 : f32
      %38 = vector.broadcast %cst_46 : f32 to vector<2x8xf32>
      %39 = arith.addf %38, %37 : vector<2x8xf32>
      %40 = arith.divf %38, %39 : vector<2x8xf32>
      %41 = vector.shape_cast %40 : vector<2x8xf32> to vector<2x1x8xf32>
      %c0_47 = arith.constant 0 : index
      %c0_48 = arith.constant 0 : index
      %c0_49 = arith.constant 0 : index
      %42 = vector.load %arg5[%c0_47, %c0_48, %c0_49] : memref<2x1x8xf32, #tpu.memory_space<vmem>>, vector<2x1x8xf32>
      tpu.vector_store %arg5[%c0_47, %c0_48, %c0_49], %41 {strides = array<i32>} : memref<2x1x8xf32, #tpu.memory_space<vmem>>, vector<2x1x8xf32>,
    } else {
    }
    return
  }
  func.func @transform_0(%arg0: i32, %arg1: i32) -> (i32, i32, i32) {
    %c0_i32 = arith.constant 0 : i32
    %c0_i32_0 = arith.constant 0 : i32
    return %arg0, %c0_i32, %arg1 : i32, i32, i32
  }
  func.func @transform_1(%arg0: i32, %arg1: i32) -> (i32, i32) {
    %c0_i32 = arith.constant 0 : i32
    %c0_i32_0 = arith.constant 0 : i32
    %c0_i32_1 = arith.constant 0 : i32
    return %c0_i32, %c0_i32_0 : i32, i32
  }
  func.func @transform_2(%arg0: i32, %arg1: i32) -> (i32, i32) {
    %c0_i32 = arith.constant 0 : i32
    %c0_i32_0 = arith.constant 0 : i32
    %c0_i32_1 = arith.constant 0 : i32
    return %c0_i32, %c0_i32_0 : i32, i32
  }
  func.func @transform_3(%arg0: i32, %arg1: i32) -> (i32, i32, i32) {
    %c0_i32 = arith.constant 0 : i32
    %c0_i32_0 = arith.constant 0 : i32
    %c0_i32_1 = arith.constant 0 : i32
    return %arg0, %c0_i32, %c0_i32_0 : i32, i32, i32
  }
}

</mosaic_0001>

<bundles_post_ra>
// kernel: tpu_custom_call.1
= control target key start
LH: loop header
LB: loop body
LE: loop exit
PB: predicated region body
PF: predicated region fallthrough
CT: control target
= control target key end

     0   :  { %8 = vsyncpa [#allocation5], 0  ;;  %s457_s0 = inlined_call_operand.hbm [shape: f32[2,8,256], index: 0, kind: input, shape index: {}]   ;;  %s458_s1 = inlined_call_operand.vmem [shape: f32[8,2], index: 1, kind: input, shape index: {}]   ;;  %s459_s2 = inlined_call_operand.vmem [shape: f32[2,8], index: 2, kind: input, shape index: {}]   ;;  %s460_s3 = inlined_call_operand.hbm [shape: f32[2,1,8], index: 3, kind: output, shape index: {}]  }
   0x1   :  { %9 = vsyncpa [#allocation6], 0  ;;  %s396_s12 = smov [#allocation4]   ;;  %s348_s16 = scalar_lea.hbm %s457_s0, 512 }
   0x2   :  { %s15_s13 = sshll.u32 %s396_s12, 4  ;;  %p349_p0 = scmp.ne.s32.totalorder %s457_s0, %s348_s16  ;;  %s16_s13 = int_to_ptr.vmem [resolvable:$true] %s15_s13 }
   0x3   :  { %p352_p1 = scmp.lt.u32.totalorder %s348_s16, %s457_s0 }
   0x5   :  { %p354_p2 = pnand %p352_p1, %p349_p0 }
   0x7   :  { %357 = shalt.err (!%p354_p2)
}
   0x8   :  { %s358_s21 = scalar_lea.vmem %s16_s13, 512  ;;  %p363_p4 = scmp.lt.s32.totalorder %s16_s13, %s16_s13 }
   0x9   :  { %p359_p3 = scmp.ne.s32.totalorder %s16_s13, %s358_s21  ;;  %p364_p5 = scmp.lt.s32.totalorder %s358_s21, %s358_s21 }
   0xb   :  { %p365_p6 = por %p364_p5, %p363_p4 }
   0xd   :  { %p366_p7 = pnand %p365_p6, %p359_p3 }
   0xf   :  { %369 = shalt.err (!%p366_p7)
}
  0x10   :  { %s397_s22 = smov 256   ;;  %s398_s23 = smov 16  }
  0x11   :  { %21 = dma.hbm_to_vmem [thread:$0]  %s457_s0, 512, %s16_s13, [#allocation5], %s397_s22, %s397_s22, %s398_s23  }
  0x12   :  { %392 = dma.done.wait [#allocation5], 512  }
  0x13   :  { %393 = vsyncadd [#allocation5], 4294966784  ;;  %v37_v0 = vld [vmem:[#allocation4] sm:$0xff]  ;;  %v51_v1 = vld [vmem:[#allocation4 + $0x8] sm:$0xff]  ;;  %v399_v9 = vmov 0.0   ;;  %vm400_vm0 = vmmov 0   ;;  %v81_v10 = vlaneseq }
  0x14   :  { %v38_v2 = vld [vmem:[#allocation4 + $0x10] sm:$0xff]  ;;  %v61_v3 = vmax.f32 %v37_v0, %v51_v1  ;;  %v55_v4 = vadd.f32 %v51_v1, %v37_v0  ;;  %v52_v5 = vld [vmem:[#allocation4 + $0x18] sm:$0xff]  ;;  %v109_v8 = vld [vmem:[%s458_s1] sm:$0xff]  ;;  %326 = vmatprep.subr.mxu0 %v399_v9  ;;  %328 = vmatprep.mubr.msk.f32.mxu0 %vm400_vm0, %v399_v9  ;;  %vm104_vm1 = vcmask 1043459   ;;  %vm91_vm2 = vcmask 1041409  }
  0x15   :  { %v62_v6 = vmax.f32 %v38_v2, %v52_v5  ;;  %v56_v7 = vadd.f32 %v52_v5, %v38_v2  ;;  %327 = vmatpush3.msra.mxu0 %v109_v8  ;;  %331 = vmatprep.subr.mxu1 %v399_v9  ;;  %v82_v11 = vand.u32 127, %v81_v10  ;;  %v84_v12 = vshrl.u32 %v81_v10, 7  ;;  %v185_v27 = vld [vmem:[%s459_s2] sm:$0x3]  ;;  %s402_s2 = smov [#allocation7]  }
  0x16   :  { %75 = vmax.xlane.f32.xlu1 %v61_v3  ;;  %67 = vadd.xlane.f32.xlu0 %v55_v4  ;;  %vm107_vm3 = vcmask 1041408   ;;  %vm110_vm4 = vcmask 64512   ;;  %vm186_vm5 = vcmask 15360   ;;  %v401_v38 = vmov 1966171168   ;;  %s306_s28 = sshll.u32 %s402_s2, 4  ;;  %s307_s28 = int_to_ptr.vmem [resolvable:$true] %s306_s28 }
  0x17   :  { %333 = vmatprep.mubr.msk.f32.mxu1 %vm400_vm0, %v399_v9  ;;  %v85_v15 = vsub.s32 %v82_v11, %v84_v12  ;;  %332 = vmatpush3.msk.msra.mxu1 %vm107_vm3, %v185_v27  ;;  %v275_v39 = vunpack.c.l.s4 %v401_v38  ;;  %vm298_vm6 = vcmask 57344   ;;  %s370_s29 = scalar_lea.vmem %s307_s28, 32  ;;  %p375_p9 = scmp.lt.s32.totalorder %s307_s28, %s307_s28 }
  0x18   :  { %p371_p8 = scmp.ne.s32.totalorder %s307_s28, %s370_s29  ;;  %p376_p10 = scmp.lt.s32.totalorder %s370_s29, %s370_s29 }
  0x19   :  { %v276_v40 = vunpack.c.0.s8 %v275_v39 }
  0x1a   :  { %77 = vmax.xlane.f32.xlu1 %v62_v6  ;;  %69 = vadd.xlane.f32.xlu0 %v56_v7  ;;  %p377_p11 = por %p376_p10, %p375_p9 }
  0x1b   :  { %v279_v41 = vsub.s32 %v276_v40, %v84_v12 }
  0x1c   :  { %p378_p12 = pnand %p377_p11, %p371_p8 }
  0xa3   :  { %v76_v13 = vpop.xlane.xlu1 %75  ;;  %v68_v14 = vpop.xlane.xlu0 %67 }
  0xa4   :  { %v71_v16 = vmul.f32 0.00390625, %v68_v14  ;;  %v99_v21 = vrot.slane %v76_v13, %v85_v15 }
  0xa6   :  { %v86_v22 = vrot.slane %v71_v16, %v85_v15 }
  0xa7   :  { %v78_v17 = vpop.xlane.xlu1 %77  ;;  %v70_v18 = vpop.xlane.xlu0 %69 }
  0xa8   :  { %v103_v19 = vrot.slane %v78_v17, %v85_v15  ;;  %v72_v20 = vmul.f32 0.00390625, %v70_v18 }
  0xaa   :  { %v90_v23 = vrot.slane %v72_v20, %v85_v15  ;;  %v105_v24 = vsel %vm104_vm1, %v103_v19, %v99_v21 }
  0xac   :  { %v92_v25 = vsel %vm91_vm2, %v90_v23, %v86_v22 }
  0xad   :  { %v108_v26 = vsel %vm107_vm3, %v92_v25, %v105_v24 }
  0xae   :  { %329 = vmatmul.mubr.msk.f32.vlgmr.msra.gmra.mrb[0].mxu0 %vm110_vm4, %v108_v26 }
 0x181   :  { %v180_v28 = vpop.f32.mrb[0].mxu0 }
 0x182   :  { %v184_v29 = vmax.f32 %v180_v28, 0.0  ;;  %v330_v30 = vpop.f32.mrb[1].mxu0 }
 0x184   :  { %334 = vmatmul.mubr.msk.f32.vlgmr.msra.gmra.mrb[0].mxu1 %vm186_vm5, %v184_v29 }
 0x257   :  { %v259_v31 = vpop.f32.mrb[0].mxu1 }
 0x258   :  { %v264_v32 = vrot.slane %v259_v31, 2  ;;  %v335_v33 = vpop.f32.mrb[1].mxu1 }
 0x25a   :  { %v266_v34 = vadd.f32 %v264_v32, %v259_v31 }
 0x25c   :  { %v321_v35 = vmul.f32 -1.442695, %v266_v34 }
 0x25e   :  { %344 = vpow2.f32 %v321_v35 }
 0x268   :  { %v345_v36 = vpop.eup %344 }
 0x269   :  { %v270_v37 = vadd.f32 1.0, %v345_v36 }
 0x26b   :  { %346 = vrcp.f32 %v270_v37 }
 0x275   :  { %v347_v42 = vpop.eup %346 }
 0x276   :  { %v280_v43 = vrot.slane %v347_v42, %v279_v41 }
 0x278   :  { %v281_v44 = vcombine.high %v280_v43, %v280_v43  ;;  %v288_v45 = vrot.slane %v280_v43, %v279_v41 }
 0x27a   :  { %v295_v46 = vrot.slane %v281_v44, %v279_v41  ;;  %299 = vst.msk [vmem:[#allocation7] sm:$0x1] %vm298_vm6, %v288_v45 }
 0x27c   :  { %300 = vst.msk [vmem:[#allocation7 + $0x1] sm:$0x1] %vm298_vm6, %v295_v46 }
 0x27d   :  { %381 = shalt.err (!%p378_p12)
}
 0x27e   :  { %s382_s5 = scalar_lea.hbm %s460_s3, 32 }
 0x27f   :  { %p383_p13 = scmp.ne.s32.totalorder %s460_s3, %s382_s5  ;;  %p386_p0 = scmp.lt.u32.totalorder %s382_s5, %s460_s3 }
 0x281   :  { %p388_p1 = pnand %p386_p0, %p383_p13 }
 0x283   :  { %391 = shalt.err (!%p388_p1)
}
 0x284   :  { %s403_s10 = smov 1  }
 0x285   :  { %312 = dma.vmem_to_hbm [thread:$0]  %s307_s28, 32, %s460_s3, [#allocation6], %s398_s23, %s398_s23, %s403_s10  }
 0x286   :  { %394 = dma.done.wait [#allocation6], 32  }
 0x287   :  { %395 = vsyncadd [#allocation6], 4294967264 }
 0x288   :  { %316 = vsyncpa [#allocation5], 1 }
 0x289   :  { %317 = vsyncpa [#allocation6], 1 }

</bundles_post_ra>
